<compile_context>
chip_gen: v5e
topology: v5e:2x2
jax: 0.10.0
libtpu: 0.0.40
codegen_flags: <defaults>
</compile_context>

<pallas_src>
import jax
import jax.numpy as jnp
from jax.experimental import pallas as pl
from jax.experimental.pallas import tpu as pltpu


_TARGET_BLOCK_BYTES = 4 * 1024 * 1024  # ~4 MiB per block


def _mish_kernel(x_ref, o_ref):
    xf = x_ref[...].astype(jnp.float32)
    # tanh(ln(1+t)) == t*(t+2) / (t*(t+2) + 2), t = exp(x).  Clamp the exponent
    # at 20: for x > 20 the tanh(softplus(x)) factor is 1.0 to f32 precision,
    # and the clamp keeps t*(t+2) far from f32 overflow.
    t = jnp.exp(jnp.minimum(xf, 20.0))
    num = t * (t + 2.0)
    y = xf * (num / (num + 2.0))
    o_ref[...] = y.astype(o_ref.dtype)


def _mish_jnp(x):
    """Plain-jnp mish (used only for the <128-element ragged tail)."""
    xf = x.astype(jnp.float32)
    sp = jnp.maximum(xf, 0.0) + jnp.log1p(jnp.exp(-jnp.abs(xf)))
    return (xf * jnp.tanh(sp)).astype(x.dtype)


def _run_slab(slab, tile_rows):
    rows, cols = slab.shape
    n = rows * cols
    itemsize = jnp.dtype(slab.dtype).itemsize
    grid = (pl.cdiv(rows, tile_rows),)
    return pl.pallas_call(
        _mish_kernel,
        out_shape=jax.ShapeDtypeStruct((rows, cols), slab.dtype),
        grid_spec=pltpu.PrefetchScalarGridSpec(
            num_scalar_prefetch=0,
            grid=grid,
            in_specs=[pl.BlockSpec((tile_rows, cols), lambda i: (i, 0))],
            out_specs=pl.BlockSpec((tile_rows, cols), lambda i: (i, 0)),
        ),
        compiler_params=pltpu.CompilerParams(
            dimension_semantics=("parallel",),
            # 16 MiB resident (4 MiB x 2 bufs x in+out); raise the scoped VMEM
            # cap so v5e (16 MiB default) doesn't fall over; safe on v6e/v7x.
            vmem_limit_bytes=32 << 20,
        ),
        cost_estimate=pl.CostEstimate(
            flops=6 * n,
            transcendentals=n,            # one exp per element
            bytes_accessed=2 * n * itemsize,
        ),
    )(slab)


def _mish_flat_aligned(flat):
    """mish over a flat array whose length is a nonzero multiple of 128."""
    n = flat.shape[0]
    itemsize = jnp.dtype(flat.dtype).itemsize

    # Widest lane dim (multiple of 128) dividing n -> lane-dense, unmasked vst.
    cols = 128
    for c in (1024, 512, 256, 128):
        if n % c == 0:
            cols = c
            break
    rows = n // cols

    # Dtype-aware sublane packing: 8 rows (f32), 16 (bf16/f16), 32 (8-bit).
    packing = max(8, 32 // itemsize)
    desired = max(packing, (_TARGET_BLOCK_BYTES // (cols * itemsize)) // packing * packing)

    if rows <= packing:
        tile_rows = rows  # single block == full array extent (always legal)
    else:
        # Smallest EVEN block count whose per-block rows fit the VMEM budget,
        # so the "parallel" grid axis shards evenly across v7x's two TCs.
        nblk = 2 * max(1, -(-rows // (2 * desired)))
        tile_rows = -(-(-(-rows // nblk)) // packing) * packing  # round_up(cdiv(rows, nblk), packing)

    out = _run_slab(flat.reshape(rows, cols), tile_rows)
    return out.reshape(-1)


def mish(x):
    """Apply mish elementwise to an array of any shape (output: same shape/dtype)."""
    orig_shape = x.shape
    n = x.size
    if n == 0:
        return x

    flat = x.reshape(-1)
    n_aligned = (n // 128) * 128
    tail = n - n_aligned

    if tail == 0:
        out_flat = _mish_flat_aligned(flat)
    elif n_aligned == 0:
        # Fewer than 128 elements: not worth a kernel launch.
        out_flat = _mish_jnp(flat)
    else:
        # Ragged (uncommon): aligned prefix through the kernel, tiny tail in
        # jnp, stitch.  Avoids the full-array pad that the old path paid.
        head = _mish_flat_aligned(flat[:n_aligned])
        out_flat = jnp.concatenate([head, _mish_jnp(flat[n_aligned:])])

    return out_flat.reshape(orig_shape)


def mish_reference(x):
    xf = x.astype(jnp.float32)
    sp = jnp.maximum(xf, 0.0) + jnp.log1p(jnp.exp(-jnp.abs(xf)))
    return (xf * jnp.tanh(sp)).astype(x.dtype)


if __name__ == "__main__":
    cases = [
        # Conv-style NCHW input (N, *): aligned fast path, single block.
        jax.random.normal(jax.random.PRNGKey(0), (2, 4, 16, 16), dtype=jnp.float32),
        # Larger aligned input: exercises the even (grid=2) megacore split.
        jax.random.normal(jax.random.PRNGKey(1), (8, 4, 32, 32), dtype=jnp.float32),
        # Ragged, < 128 elements: pure-jnp tail path.
        jax.random.normal(jax.random.PRNGKey(2), (3, 5, 7), dtype=jnp.float32),
        # Ragged, > 128 elements: kernel prefix + jnp tail + stitch.
        jax.random.normal(jax.random.PRNGKey(3), (257,), dtype=jnp.float32),
        # bf16: exercises dtype-aware sublane packing and the cast path.
        jax.random.normal(jax.random.PRNGKey(4), (2, 256), dtype=jnp.bfloat16),
    ]
    for x in cases:
        y = jax.block_until_ready(mish(x))
        y_ref = mish_reference(x)
        assert y.shape == x.shape and y.dtype == x.dtype, (y.shape, y.dtype, x.shape, x.dtype)
        tol = 1e-5 if x.dtype == jnp.float32 else 2e-2
        assert jnp.allclose(y.astype(jnp.float32), y_ref.astype(jnp.float32),
                            atol=tol, rtol=tol), f"mismatch for shape {x.shape} dtype {x.dtype}"
    print("KERNEL_OK")
</pallas_src>

<mosaic_0001>
module attributes {stable_mosaic.version = 11 : i64} {
  func.func @_mish_kernel(%arg0: i32, %arg1: memref<2x1024xf32, #tpu.memory_space<vmem>>, %arg2: memref<2x1024xf32, #tpu.memory_space<vmem>>) attributes {dimension_semantics = [#tpu.dimension_semantics<parallel>], iteration_bounds = array<i64: 1>, scalar_prefetch = 0 : i64, scratch_operands = 0 : i64, tpu.core_type = #tpu.core_type<tc>, window_params = [{transform_indices = @transform_0, window_bounds = array<i64: 2, 1024>}, {transform_indices = @transform_1, window_bounds = array<i64: 2, 1024>}]} {
    %c0 = arith.constant 0 : index
    %c0_0 = arith.constant 0 : index
    %0 = vector.load %arg1[%c0, %c0_0] : memref<2x1024xf32, #tpu.memory_space<vmem>>, vector<2x1024xf32>
    %cst = arith.constant 2.000000e+01 : f32
    %1 = vector.broadcast %cst : f32 to vector<2x1024xf32>
    %2 = arith.minimumf %0, %1 : vector<2x1024xf32>
    %3 = math.exp %2 : vector<2x1024xf32>
    %cst_1 = arith.constant 2.000000e+00 : f32
    %4 = vector.broadcast %cst_1 : f32 to vector<2x1024xf32>
    %5 = arith.addf %3, %4 : vector<2x1024xf32>
    %6 = arith.mulf %3, %5 : vector<2x1024xf32>
    %cst_2 = arith.constant 2.000000e+00 : f32
    %7 = vector.broadcast %cst_2 : f32 to vector<2x1024xf32>
    %8 = arith.addf %6, %7 : vector<2x1024xf32>
    %9 = arith.divf %6, %8 : vector<2x1024xf32>
    %10 = arith.mulf %0, %9 : vector<2x1024xf32>
    %c0_3 = arith.constant 0 : index
    %c0_4 = arith.constant 0 : index
    %11 = vector.load %arg2[%c0_3, %c0_4] : memref<2x1024xf32, #tpu.memory_space<vmem>>, vector<2x1024xf32>
    tpu.vector_store %arg2[%c0_3, %c0_4], %10 {strides = array<i32>} : memref<2x1024xf32, #tpu.memory_space<vmem>>, vector<2x1024xf32>,
    return
  }
  func.func @transform_0(%arg0: i32) -> (i32, i32) {
    %c0_i32 = arith.constant 0 : i32
    %c0_i32_0 = arith.constant 0 : i32
    return %arg0, %c0_i32 : i32, i32
  }
  func.func @transform_1(%arg0: i32) -> (i32, i32) {
    %c0_i32 = arith.constant 0 : i32
    %c0_i32_0 = arith.constant 0 : i32
    return %arg0, %c0_i32 : i32, i32
  }
}

</mosaic_0001>

<bundles_post_ra>
// kernel: tpu_custom_call.1
= control target key start
LH: loop header
LB: loop body
LE: loop exit
PB: predicated region body
PF: predicated region fallthrough
CT: control target
= control target key end

     0   :  { %6 = vsyncpa [#allocation3], 0  ;;  %s168_s0 = inlined_call_operand.hbm [shape: f32[2,1024], index: 0, kind: input, shape index: {}]   ;;  %s169_s1 = inlined_call_operand.hbm [shape: f32[2,1024], index: 1, kind: output, shape index: {}]  }
   0x1   :  { %7 = vsyncpa [#allocation4], 0  ;;  %s13_s8 = sshll.u32 %s168_s0, 4  ;;  %s150_s9 = smov [#allocation2]   ;;  %s14_s8 = int_to_ptr.hbm [resolvable:$true] %s13_s8 }
   0x2   :  { %s15_s10 = sshll.u32 %s150_s9, 4  ;;  %s16_s10 = int_to_ptr.vmem [resolvable:$true] %s15_s10 }
   0x3   :  { %18 = dma.hbm_to_vmem [thread:$0]  %s14_s8, 256, %s16_s10, [#allocation3]  }
   0x4   :  { %146 = dma.done.wait [#allocation3], 256  }
   0x5   :  { %147 = vsyncadd [#allocation3], 4294967040  ;;  %v23_v0 = vld [vmem:[#allocation2] sm:$0xff]  ;;  %v24_v1 = vld [vmem:[#allocation2 + $0x8] sm:$0xff]  ;;  %s151_s0 = smov [#allocation5]   ;;  %s78_s14 = sshll.u32 %s169_s1, 4  ;;  %s79_s14 = int_to_ptr.hbm [resolvable:$true] %s78_s14 }
   0x6   :  { %v25_v2 = vmin.f32 %v23_v0, 20.0  ;;  %v26_v3 = vmin.f32 %v24_v1, 20.0  ;;  %s76_s11 = sshll.u32 %s151_s0, 4  ;;  %s77_s11 = int_to_ptr.vmem [resolvable:$true] %s76_s11 }
   0x8   :  { %v27_v4 = vmul.f32 1.442695, %v25_v2  ;;  %v29_v5 = vmul.f32 1.442695, %v26_v3 }
   0xa   :  { %90 = vpow2.f32 %v27_v4 }
   0xb   :  { %92 = vpow2.f32 %v29_v5 }
  0x10   :  { %v91_v6 = vpop.eup %90 }
  0x11   :  { %v93_v7 = vpop.eup %92  ;;  %v31_v8 = vadd.f32 2.0, %v91_v6 }
  0x12   :  { %v32_v9 = vadd.f32 2.0, %v93_v7 }
  0x13   :  { %v33_v10 = vmul.f32 %v91_v6, %v31_v8 }
  0x14   :  { %v34_v11 = vmul.f32 %v93_v7, %v32_v9 }
  0x15   :  { %v35_v12 = vadd.f32 2.0, %v33_v10 }
  0x16   :  { %v36_v13 = vadd.f32 2.0, %v34_v11 }
  0x17   :  { %94 = vrcp.f32 %v35_v12  ;;  %vm42_vm0 = vweird.f32 %v35_v12  ;;  %v48_v17 = vand.u32 2147483648, %v35_v12  ;;  %v46_v20 = vand.u32 2147483647, %v35_v12 }
  0x18   :  { %96 = vrcp.f32 %v36_v13  ;;  %v63_v21 = vand.u32 2147483648, %v36_v13  ;;  %vm57_vm2 = vweird.f32 %v36_v13  ;;  %v61_v23 = vand.u32 2147483647, %v36_v13 }
  0x19   :  { %v49_v25 = vor.u32 1.1754944e-38, %v48_v17  ;;  %vm47_vm5 = vcmp.eq.f32.partialorder %v46_v20, 8.507059e+37 }
  0x1a   :  { %v64_v28 = vor.u32 1.1754944e-38, %v63_v21  ;;  %vm62_vm7 = vcmp.eq.f32.partialorder %v61_v23, 8.507059e+37 }
  0x1d   :  { %v95_v14 = vpop.eup %94 }
  0x1e   :  { %v97_v15 = vpop.eup %96  ;;  %v38_v16 = vmul.f32 %v95_v14, %v35_v12  ;;  %vm43_vm1 = vweird.f32 %v95_v14 }
  0x1f   :  { %v53_v18 = vmul.f32 %v97_v15, %v36_v13  ;;  %vm58_vm3 = vweird.f32 %v97_v15  ;;  %vm44_vm4 = vmor %vm42_vm0, %vm43_vm1 }
  0x20   :  { %v39_v19 = vsub.f32 1.0, %v38_v16  ;;  %vm59_vm6 = vmor %vm57_vm2, %vm58_vm3 }
  0x21   :  { %v54_v22 = vsub.f32 1.0, %v53_v18 }
  0x22   :  { %v40_v24 = vmul.f32 %v95_v14, %v39_v19 }
  0x23   :  { %v55_v26 = vmul.f32 %v97_v15, %v54_v22 }
  0x24   :  { %v41_v27 = vadd.f32 %v95_v14, %v40_v24 }
  0x25   :  { %v56_v29 = vadd.f32 %v97_v15, %v55_v26 }
  0x26   :  { %v45_v30 = vsel %vm44_vm4, %v95_v14, %v41_v27 }
  0x27   :  { %v50_v31 = vsel %vm47_vm5, %v49_v25, %v45_v30  ;;  %v60_v32 = vsel %vm59_vm6, %v97_v15, %v56_v29 }
  0x28   :  { %v51_v33 = vmul.f32 %v50_v31, %v33_v10  ;;  %v65_v34 = vsel %vm62_vm7, %v64_v28, %v60_v32 }
  0x29   :  { %v66_v35 = vmul.f32 %v65_v34, %v34_v11 }
  0x2a   :  { %v67_v36 = vmul.f32 %v51_v33, %v23_v0 }
  0x2b   :  { %v68_v37 = vmul.f32 %v66_v35, %v24_v1 }
  0x2c   :  { %69 = vst [vmem:[#allocation5] sm:$0xff] %v67_v36 }
  0x2d   :  { %70 = vst [vmem:[#allocation5 + $0x8] sm:$0xff] %v68_v37 }
  0x2e   :  { %81 = dma.vmem_to_hbm [thread:$0]  %s77_s11, 256, %s79_s14, [#allocation4]  }
  0x2f   :  { %148 = dma.done.wait [#allocation4], 256  }
  0x30   :  { %149 = vsyncadd [#allocation4], 4294967040 }
  0x31   :  { %86 = vsyncpa [#allocation3], 1 }
  0x32   :  { %87 = vsyncpa [#allocation4], 1 }

</bundles_post_ra>
